<compile_context>
chip_gen: v7x
topology: tpu7x:2x2x1
jax: 0.10.0
libtpu: 0.0.40
codegen_flags: <defaults>
</compile_context>

<pallas_src>
import functools

import jax
import jax.numpy as jnp
from jax.experimental import pallas as pl
from jax.experimental.pallas import tpu as pltpu

K_IN = 28 * 28        # 784
K_PAD = 896           # 784 rounded up to a multiple of 128
H1 = 128
H2 = 64
H2_PAD = 128          # hidden-2 padded to a full lane width
N_OUT = 10
N_OUT_PAD = 128       # lane-dense padded logits width


def _round_up(n, m):
    return (n + m - 1) // m * m


def mlp_kernel(x_ref, w1_ref, b1_ref, w2_ref, b2_ref, w3_ref, b3_ref, o_ref):
    """Fused 3-layer MLP forward on one (TILE_B, K_PAD) batch tile.

    x: bf16 (TILE_B, 896); w1/w2/w3: bf16 (zero-padded); b1/b2/b3: f32.
    Matmuls accumulate in f32 on the MXU; intermediates stay in vregs.
    """
    x = x_ref[...]                                                   # bf16

    # fc1 + relu
    h1 = jnp.dot(x, w1_ref[...], preferred_element_type=jnp.float32)
    h1 = jnp.maximum(h1 + b1_ref[...], 0.0).astype(jnp.bfloat16)

    # fc2 + relu (output padded to 128 lanes; padded cols are exactly zero)
    h2 = jnp.dot(h1, w2_ref[...], preferred_element_type=jnp.float32)
    h2 = jnp.maximum(h2 + b2_ref[...], 0.0).astype(jnp.bfloat16)

    # fc3 (no activation), lane-dense (128-wide, zero-padded) store
    h3 = jnp.dot(h2, w3_ref[...], preferred_element_type=jnp.float32)
    o_ref[...] = (h3 + b3_ref[...]).astype(o_ref.dtype)


@functools.partial(jax.jit, static_argnames=("tile_b",))
def simple_nn_forward(x, params, tile_b=1024):
    """x: any shape that flattens to (-1, 784), e.g. (B, 1, 28, 28)."""
    w1, b1, w2, b2, w3, b3 = params
    x2d = x.reshape(-1, K_IN).astype(jnp.float32)
    B = x2d.shape[0]

    # Batch tile: large (1024 rows fits easily in v5e/v6e/v7x VMEM budgets),
    # shrunk for small batches; multiple of 16 for bf16 sublane packing.
    tile_b = min(tile_b, _round_up(B, 16))
    b_pad = _round_up(B, tile_b)

    # Pad batch rows and the contraction dim (784 -> 896); cast to bf16.
    # (cast + pad fuse into one XLA op inside the jit.)
    x_p = jnp.pad(x2d, ((0, b_pad - B), (0, K_PAD - K_IN))).astype(jnp.bfloat16)

    # Weights in bf16 (memory-bound kernel -> halve HBM traffic), zero-padded
    # so every matmul dimension is a multiple of 128.
    w1_p = jnp.pad(w1.astype(jnp.bfloat16), ((0, K_PAD - K_IN), (0, 0)))
    w2_p = jnp.pad(w2.astype(jnp.bfloat16), ((0, 0), (0, H2_PAD - H2)))
    w3_p = jnp.pad(w3.astype(jnp.bfloat16),
                   ((0, H2_PAD - H2), (0, N_OUT_PAD - N_OUT)))
    b1_p = b1.astype(jnp.float32)
    b2_p = jnp.pad(b2.astype(jnp.float32), ((0, 0), (0, H2_PAD - H2)))
    b3_p = jnp.pad(b3.astype(jnp.float32), ((0, 0), (0, N_OUT_PAD - N_OUT)))

    grid = (b_pad // tile_b,)
    const = lambda i: (0, 0)   # weights/biases: same full-size block every step

    flops = 2 * b_pad * (K_PAD * H1 + H1 * H2_PAD + H2_PAD * N_OUT_PAD)
    bytes_accessed = (
        x_p.size * 2
        + (w1_p.size + w2_p.size + w3_p.size) * 2
        + (b1_p.size + b2_p.size + b3_p.size) * 4
        + b_pad * N_OUT_PAD * 4
    )

    out = pl.pallas_call(
        mlp_kernel,
        out_shape=jax.ShapeDtypeStruct((b_pad, N_OUT_PAD), jnp.float32),
        grid=grid,
        in_specs=[
            pl.BlockSpec((tile_b, K_PAD), lambda i: (i, 0)),   # x: batch-tiled
            pl.BlockSpec((K_PAD, H1), const),                  # w1 resident
            pl.BlockSpec((1, H1), const),                      # b1
            pl.BlockSpec((H1, H2_PAD), const),                 # w2 (padded)
            pl.BlockSpec((1, H2_PAD), const),                  # b2 (padded)
            pl.BlockSpec((H2_PAD, N_OUT_PAD), const),          # w3 (padded)
            pl.BlockSpec((1, N_OUT_PAD), const),               # b3 (padded)
        ],
        out_specs=pl.BlockSpec((tile_b, N_OUT_PAD), lambda i: (i, 0)),
        compiler_params=pltpu.CompilerParams(
            dimension_semantics=("parallel",),
        ),
        cost_estimate=pl.CostEstimate(
            flops=flops, transcendentals=0, bytes_accessed=bytes_accessed
        ),
    )(x_p, w1_p, b1_p, w2_p, b2_p, w3_p, b3_p)

    # Drop batch padding and the 118 zero-padded logit columns.
    return out[:B, :N_OUT]


def init_params(key):
    """Deterministic init mimicking nn.Linear's U(-1/sqrt(fan_in), 1/sqrt(fan_in)).

    Weights are stored transposed relative to PyTorch: (in_features, out_features).
    """
    def linear(key, fan_in, fan_out):
        kw, kb = jax.random.split(key)
        bound = 1.0 / jnp.sqrt(fan_in)
        w = jax.random.uniform(kw, (fan_in, fan_out), jnp.float32, -bound, bound)
        b = jax.random.uniform(kb, (1, fan_out), jnp.float32, -bound, bound)
        return w, b

    k1, k2, k3 = jax.random.split(key, 3)
    w1, b1 = linear(k1, K_IN, H1)
    w2, b2 = linear(k2, H1, H2)
    w3, b3 = linear(k3, H2, N_OUT)
    return (w1, b1, w2, b2, w3, b3)


def _ref_forward_f32(x, params):
    """Pure-JAX full-f32 reference (PyTorch-equivalent math)."""
    w1, b1, w2, b2, w3, b3 = params
    h = x.reshape(-1, K_IN).astype(jnp.float32)
    h = jnp.maximum(h @ w1 + b1, 0.0)
    h = jnp.maximum(h @ w2 + b2, 0.0)
    return h @ w3 + b3


def _ref_forward_bf16(x, params):
    """Pure-JAX reference mirroring the kernel's bf16-input / f32-accum math."""
    w1, b1, w2, b2, w3, b3 = params
    h = x.reshape(-1, K_IN).astype(jnp.bfloat16)
    h = jnp.dot(h, w1.astype(jnp.bfloat16), preferred_element_type=jnp.float32)
    h = jnp.maximum(h + b1, 0.0).astype(jnp.bfloat16)
    h = jnp.dot(h, w2.astype(jnp.bfloat16), preferred_element_type=jnp.float32)
    h = jnp.maximum(h + b2, 0.0).astype(jnp.bfloat16)
    h = jnp.dot(h, w3.astype(jnp.bfloat16), preferred_element_type=jnp.float32)
    return h + b3


if __name__ == "__main__":
    key = jax.random.PRNGKey(0)
    k_params, k_x = jax.random.split(key)

    params = init_params(k_params)
    # Small MNIST-like batch: (B, 1, 28, 28) NCHW, flattened inside forward.
    x = jax.random.normal(k_x, (8, 1, 28, 28), dtype=jnp.float32)

    out = jax.block_until_ready(simple_nn_forward(x, params))

    assert out.shape == (8, N_OUT), out.shape
    ref_bf16 = _ref_forward_bf16(x, params)
    ref_f32 = _ref_forward_f32(x, params)
    assert jnp.allclose(out, ref_bf16, atol=2e-2, rtol=2e-2), "mismatch vs bf16 reference"
    assert jnp.allclose(out, ref_f32, atol=1e-1, rtol=1e-1), "mismatch vs f32 reference"

    print("KERNEL_OK")
</pallas_src>

<mosaic_0001>
module attributes {stable_mosaic.version = 11 : i64} {
  func.func @mlp_kernel(%arg0: i32, %arg1: memref<16x896xbf16, #tpu.memory_space<vmem>>, %arg2: memref<896x128xbf16, #tpu.memory_space<vmem>>, %arg3: memref<1x128xf32, #tpu.memory_space<vmem>>, %arg4: memref<128x128xbf16, #tpu.memory_space<vmem>>, %arg5: memref<1x128xf32, #tpu.memory_space<vmem>>, %arg6: memref<128x128xbf16, #tpu.memory_space<vmem>>, %arg7: memref<1x128xf32, #tpu.memory_space<vmem>>, %arg8: memref<16x128xf32, #tpu.memory_space<vmem>>) attributes {dimension_semantics = [#tpu.dimension_semantics<parallel>], iteration_bounds = array<i64: 1>, scalar_prefetch = 0 : i64, scratch_operands = 0 : i64, tpu.core_type = #tpu.core_type<tc>, window_params = [{transform_indices = @transform_0, window_bounds = array<i64: 16, 896>}, {pipeline_mode = #tpu.pipeline_mode<synchronous>, transform_indices = @transform_1, window_bounds = array<i64: 896, 128>}, {pipeline_mode = #tpu.pipeline_mode<synchronous>, transform_indices = @transform_2, window_bounds = array<i64: 1, 128>}, {pipeline_mode = #tpu.pipeline_mode<synchronous>, transform_indices = @transform_3, window_bounds = array<i64: 128, 128>}, {pipeline_mode = #tpu.pipeline_mode<synchronous>, transform_indices = @transform_4, window_bounds = array<i64: 1, 128>}, {pipeline_mode = #tpu.pipeline_mode<synchronous>, transform_indices = @transform_5, window_bounds = array<i64: 128, 128>}, {pipeline_mode = #tpu.pipeline_mode<synchronous>, transform_indices = @transform_6, window_bounds = array<i64: 1, 128>}, {transform_indices = @transform_7, window_bounds = array<i64: 16, 128>}]} {
    %c0 = arith.constant 0 : index
    %c0_0 = arith.constant 0 : index
    %0 = vector.load %arg1[%c0, %c0_0] : memref<16x896xbf16, #tpu.memory_space<vmem>>, vector<16x896xbf16>
    %c0_1 = arith.constant 0 : index
    %c0_2 = arith.constant 0 : index
    %1 = vector.load %arg2[%c0_1, %c0_2] : memref<896x128xbf16, #tpu.memory_space<vmem>>, vector<896x128xbf16>
    %cst = arith.constant dense<0.000000e+00> : vector<16x128xf32>
    %2 = tpu.matmul %0, %1, %cst {dimension_numbers = #tpu.dot_dimension_numbers<[1], [0], [0], [1], [0, 0, 1, 1], [], []>} : vector<16x896xbf16>, vector<896x128xbf16>, vector<16x128xf32> -> vector<16x128xf32>
    %c0_3 = arith.constant 0 : index
    %c0_4 = arith.constant 0 : index
    %3 = vector.load %arg3[%c0_3, %c0_4] : memref<1x128xf32, #tpu.memory_space<vmem>>, vector<1x128xf32>
    %4 = vector.broadcast %3 : vector<1x128xf32> to vector<16x128xf32>
    %5 = arith.addf %2, %4 : vector<16x128xf32>
    %cst_5 = arith.constant 0.000000e+00 : f32
    %6 = vector.broadcast %cst_5 : f32 to vector<16x128xf32>
    %7 = arith.maximumf %5, %6 : vector<16x128xf32>
    %8 = arith.truncf %7 : vector<16x128xf32> to vector<16x128xbf16>
    %c0_6 = arith.constant 0 : index
    %c0_7 = arith.constant 0 : index
    %9 = vector.load %arg4[%c0_6, %c0_7] : memref<128x128xbf16, #tpu.memory_space<vmem>>, vector<128x128xbf16>
    %cst_8 = arith.constant dense<0.000000e+00> : vector<16x128xf32>
    %10 = tpu.matmul %8, %9, %cst_8 {dimension_numbers = #tpu.dot_dimension_numbers<[1], [0], [0], [1], [0, 0, 1, 1], [], []>} : vector<16x128xbf16>, vector<128x128xbf16>, vector<16x128xf32> -> vector<16x128xf32>
    %c0_9 = arith.constant 0 : index
    %c0_10 = arith.constant 0 : index
    %11 = vector.load %arg5[%c0_9, %c0_10] : memref<1x128xf32, #tpu.memory_space<vmem>>, vector<1x128xf32>
    %12 = vector.broadcast %11 : vector<1x128xf32> to vector<16x128xf32>
    %13 = arith.addf %10, %12 : vector<16x128xf32>
    %cst_11 = arith.constant 0.000000e+00 : f32
    %14 = vector.broadcast %cst_11 : f32 to vector<16x128xf32>
    %15 = arith.maximumf %13, %14 : vector<16x128xf32>
    %16 = arith.truncf %15 : vector<16x128xf32> to vector<16x128xbf16>
    %c0_12 = arith.constant 0 : index
    %c0_13 = arith.constant 0 : index
    %17 = vector.load %arg6[%c0_12, %c0_13] : memref<128x128xbf16, #tpu.memory_space<vmem>>, vector<128x128xbf16>
    %cst_14 = arith.constant dense<0.000000e+00> : vector<16x128xf32>
    %18 = tpu.matmul %16, %17, %cst_14 {dimension_numbers = #tpu.dot_dimension_numbers<[1], [0], [0], [1], [0, 0, 1, 1], [], []>} : vector<16x128xbf16>, vector<128x128xbf16>, vector<16x128xf32> -> vector<16x128xf32>
    %c0_15 = arith.constant 0 : index
    %c0_16 = arith.constant 0 : index
    %19 = vector.load %arg7[%c0_15, %c0_16] : memref<1x128xf32, #tpu.memory_space<vmem>>, vector<1x128xf32>
    %20 = vector.broadcast %19 : vector<1x128xf32> to vector<16x128xf32>
    %21 = arith.addf %18, %20 : vector<16x128xf32>
    %c0_17 = arith.constant 0 : index
    %c0_18 = arith.constant 0 : index
    %22 = vector.load %arg8[%c0_17, %c0_18] : memref<16x128xf32, #tpu.memory_space<vmem>>, vector<16x128xf32>
    tpu.vector_store %arg8[%c0_17, %c0_18], %21 {strides = array<i32>} : memref<16x128xf32, #tpu.memory_space<vmem>>, vector<16x128xf32>,
    return
  }
  func.func @transform_0(%arg0: i32) -> (i32, i32) {
    %c0_i32 = arith.constant 0 : i32
    %c0_i32_0 = arith.constant 0 : i32
    return %arg0, %c0_i32 : i32, i32
  }
  func.func @transform_1(%arg0: i32) -> (i32, i32) {
    %c0_i32 = arith.constant 0 : i32
    %c0_i32_0 = arith.constant 0 : i32
    %c0_i32_1 = arith.constant 0 : i32
    return %c0_i32, %c0_i32_0 : i32, i32
  }
  func.func @transform_2(%arg0: i32) -> (i32, i32) {
    %c0_i32 = arith.constant 0 : i32
    %c0_i32_0 = arith.constant 0 : i32
    %c0_i32_1 = arith.constant 0 : i32
    return %c0_i32, %c0_i32_0 : i32, i32
  }
  func.func @transform_3(%arg0: i32) -> (i32, i32) {
    %c0_i32 = arith.constant 0 : i32
    %c0_i32_0 = arith.constant 0 : i32
    %c0_i32_1 = arith.constant 0 : i32
    return %c0_i32, %c0_i32_0 : i32, i32
  }
  func.func @transform_4(%arg0: i32) -> (i32, i32) {
    %c0_i32 = arith.constant 0 : i32
    %c0_i32_0 = arith.constant 0 : i32
    %c0_i32_1 = arith.constant 0 : i32
    return %c0_i32, %c0_i32_0 : i32, i32
  }
  func.func @transform_5(%arg0: i32) -> (i32, i32) {
    %c0_i32 = arith.constant 0 : i32
    %c0_i32_0 = arith.constant 0 : i32
    %c0_i32_1 = arith.constant 0 : i32
    return %c0_i32, %c0_i32_0 : i32, i32
  }
  func.func @transform_6(%arg0: i32) -> (i32, i32) {
    %c0_i32 = arith.constant 0 : i32
    %c0_i32_0 = arith.constant 0 : i32
    %c0_i32_1 = arith.constant 0 : i32
    return %c0_i32, %c0_i32_0 : i32, i32
  }
  func.func @transform_7(%arg0: i32) -> (i32, i32) {
    %c0_i32 = arith.constant 0 : i32
    %c0_i32_0 = arith.constant 0 : i32
    return %arg0, %c0_i32 : i32, i32
  }
}

</mosaic_0001>

<bundles_post_ra>
// kernel: simple_nn_forward.1
= control target key start
LH: loop header
LB: loop body
LE: loop exit
PB: predicated region body
PF: predicated region fallthrough
CT: control target
= control target key end

     0   :  { %v1245_v38 = vmov 0.0   ;;  %vm1246_vm0 = vmmov 0   ;;  %s1569_s1 = inlined_call_operand.vmem [shape: bf16[896,128], index: 1, kind: input, shape index: {}]   ;;  %s1570_s0 = inlined_call_operand.vmem [shape: bf16[16,896], index: 0, kind: input, shape index: {}]   ;;  %s1571_s3 = inlined_call_operand.vmem [shape: bf16[128,128], index: 3, kind: input, shape index: {}]   ;;  %s1572_s5 = inlined_call_operand.vmem [shape: bf16[128,128], index: 5, kind: input, shape index: {}]   ;;  %s1573_s2 = inlined_call_operand.vmem [shape: f32[1,128], index: 2, kind: input, shape index: {}]   ;;  %s1574_s4 = inlined_call_operand.vmem [shape: f32[1,128], index: 4, kind: input, shape index: {}]   ;;  %s1575_s6 = inlined_call_operand.vmem [shape: f32[1,128], index: 6, kind: input, shape index: {}]   ;;  %s1576_s7 = inlined_call_operand.vmem [shape: f32[16,128], index: 7, kind: output, shape index: {}]  }
   0x1   :  { %v1163_v0 = vld [vmem:[%s1569_s1 + $0x40] sm:$0xff]   ;;  %v1167_v4 = vld [vmem:[%s1569_s1 + $0x48] sm:$0xff]   ;;  %v1171_v8 = vld [vmem:[%s1569_s1 + $0x50] sm:$0xff]  }
   0x2   :  { %v1164_v1 = vld [vmem:[%s1569_s1] sm:$0xff]   ;;  %1008 = vmatprep.subr.bf16.mxu0 %v1163_v0  ;;  %v1168_v5 = vld [vmem:[%s1569_s1 + $0x8] sm:$0xff]   ;;  %v1172_v9 = vld [vmem:[%s1569_s1 + $0x10] sm:$0xff]  }
   0x3   :  { %v1165_v2 = vld [vmem:[%s1569_s1 + $0xc0] sm:$0xff]   ;;  %1009 = vmatpush3.bf16.msra.mxu0 %v1164_v1  ;;  %v1169_v6 = vld [vmem:[%s1569_s1 + $0xc8] sm:$0xff]   ;;  %v1173_v10 = vld [vmem:[%s1569_s1 + $0xd0] sm:$0xff]  }
   0x4   :  { %v1166_v3 = vld [vmem:[%s1569_s1 + $0x80] sm:$0xff]   ;;  %1030 = vmatprep.subr.bf16.mxu1 %v1165_v2  ;;  %1010 = vmatprep.subr.bf16.mxu0 %v1167_v4  ;;  %v1170_v7 = vld [vmem:[%s1569_s1 + $0x88] sm:$0xff]   ;;  %v1174_v11 = vld [vmem:[%s1569_s1 + $0x90] sm:$0xff]  }
   0x5   :  { %1031 = vmatpush3.bf16.msra.mxu1 %v1166_v3  ;;  %v1175_v12 = vld [vmem:[%s1569_s1 + $0x58] sm:$0xff]   ;;  %v1179_v16 = vld [vmem:[%s1569_s1 + $0x60] sm:$0xff]   ;;  %v1183_v20 = vld [vmem:[%s1569_s1 + $0x68] sm:$0xff]  }
   0x6   :  { %1032 = vmatprep.subr.bf16.mxu1 %v1169_v6  ;;  %v1176_v13 = vld [vmem:[%s1569_s1 + $0x18] sm:$0xff]   ;;  %v1180_v17 = vld [vmem:[%s1569_s1 + $0x20] sm:$0xff]   ;;  %v1184_v21 = vld [vmem:[%s1569_s1 + $0x28] sm:$0xff]  }
   0x7   :  { %1011 = vmatpush3.bf16.msra.mxu0 %v1168_v5  ;;  %v1177_v14 = vld [vmem:[%s1569_s1 + $0xd8] sm:$0xff]   ;;  %v1181_v18 = vld [vmem:[%s1569_s1 + $0xe0] sm:$0xff]   ;;  %v1185_v22 = vld [vmem:[%s1569_s1 + $0xe8] sm:$0xff]  }
   0x8   :  { %1012 = vmatprep.subr.bf16.mxu0 %v1171_v8  ;;  %v1178_v15 = vld [vmem:[%s1569_s1 + $0x98] sm:$0xff]   ;;  %v1182_v19 = vld [vmem:[%s1569_s1 + $0xa0] sm:$0xff]   ;;  %v1186_v23 = vld [vmem:[%s1569_s1 + $0xa8] sm:$0xff]  }
   0x9   :  { %1033 = vmatpush3.bf16.msra.mxu1 %v1170_v7  ;;  %v1187_v24 = vld [vmem:[%s1569_s1 + $0x70] sm:$0xff]   ;;  %v1191_v28 = vld [vmem:[%s1569_s1 + $0x78] sm:$0xff]   ;;  %v1196_v32 = vld [vmem:[%s1570_s0 + $0x4] ss:$28 sps:$4 sm:$0xff]  }
   0xa   :  { %1034 = vmatprep.subr.bf16.mxu1 %v1173_v10  ;;  %v1188_v25 = vld [vmem:[%s1569_s1 + $0x30] sm:$0xff]   ;;  %v1192_v29 = vld [vmem:[%s1569_s1 + $0x38] sm:$0xff]   ;;  %558 = vmatprep.mubr.bf16.mxu0 %v1196_v32  ;;  %v1198_v34 = vld [vmem:[%s1569_s1 + $0x140] sm:$0xff]  }
   0xb   :  { %1013 = vmatpush3.bf16.msra.mxu0 %v1172_v9  ;;  %v1189_v26 = vld [vmem:[%s1569_s1 + $0xf0] sm:$0xff]   ;;  %v1193_v30 = vld [vmem:[%s1569_s1 + $0xf8] sm:$0xff]   ;;  %v1199_v35 = vld [vmem:[%s1570_s0 + $0x8] ss:$28 sps:$4 sm:$0xff]  }
   0xc   :  { %1014 = vmatprep.subr.bf16.mxu0 %v1175_v12  ;;  %v1190_v27 = vld [vmem:[%s1569_s1 + $0xb0] sm:$0xff]   ;;  %v1194_v31 = vld [vmem:[%s1570_s0] ss:$28 sps:$4 sm:$0xff]   ;;  %v1201_v36 = vld [vmem:[%s1570_s0 + $0xc] ss:$28 sps:$4 sm:$0xff]  }
   0xd   :  { %1035 = vmatpush3.bf16.msra.mxu1 %v1174_v11  ;;  %v1197_v33 = vld [vmem:[%s1569_s1 + $0xb8] sm:$0xff]   ;;  %v1202_v37 = vld [vmem:[%s1569_s1 + $0x100] sm:$0xff]   ;;  %599 = vmatprep.mubr.bf16.mxu1 %v1201_v36  ;;  %v1204_v40 = vld [vmem:[%s1569_s1 + $0x148] sm:$0xff]  }
   0xe   :  { %1036 = vmatprep.subr.bf16.mxu1 %v1177_v14  ;;  %v1203_v39 = vld [vmem:[%s1569_s1 + $0x180] sm:$0xff]   ;;  %v1205_v41 = vld [vmem:[%s1569_s1 + $0x108] sm:$0xff]   ;;  %v1207_v43 = vld [vmem:[%s1569_s1 + $0x150] sm:$0xff]  }
   0xf   :  { %1015 = vmatpush3.bf16.msra.mxu0 %v1176_v13  ;;  %v1206_v42 = vld [vmem:[%s1569_s1 + $0x188] sm:$0xff]   ;;  %v1208_v44 = vld [vmem:[%s1569_s1 + $0x110] sm:$0xff]   ;;  %v1210_v46 = vld [vmem:[%s1569_s1 + $0x158] sm:$0xff]  }
  0x10   :  { %1016 = vmatprep.subr.bf16.mxu0 %v1179_v16  ;;  %v1209_v45 = vld [vmem:[%s1569_s1 + $0x190] sm:$0xff]   ;;  %v1211_v47 = vld [vmem:[%s1569_s1 + $0x118] sm:$0xff]   ;;  %v1213_v49 = vld [vmem:[%s1569_s1 + $0x160] sm:$0xff]  }
  0x11   :  { %1037 = vmatpush3.bf16.msra.mxu1 %v1178_v15  ;;  %v1212_v48 = vld [vmem:[%s1569_s1 + $0x198] sm:$0xff]   ;;  %v1214_v50 = vld [vmem:[%s1569_s1 + $0x120] sm:$0xff]   ;;  %v1216_v52 = vld [vmem:[%s1569_s1 + $0x168] sm:$0xff]  }
  0x12   :  { %1038 = vmatprep.subr.bf16.mxu1 %v1181_v18  ;;  %v1215_v51 = vld [vmem:[%s1569_s1 + $0x1a0] sm:$0xff]   ;;  %v1217_v53 = vld [vmem:[%s1569_s1 + $0x128] sm:$0xff]   ;;  %v1219_v55 = vld [vmem:[%s1569_s1 + $0x170] sm:$0xff]  }
  0x13   :  { %1017 = vmatpush3.bf16.msra.mxu0 %v1180_v17  ;;  %v1218_v54 = vld [vmem:[%s1569_s1 + $0x1a8] sm:$0xff]   ;;  %v1220_v56 = vld [vmem:[%s1569_s1 + $0x130] sm:$0xff]   ;;  %v1222_v59 = vld [vmem:[%s1569_s1 + $0x178] sm:$0xff]  }
  0x14   :  { %1018 = vmatprep.subr.bf16.mxu0 %v1183_v20  ;;  %v1221_v57 = vld [vmem:[%s1569_s1 + $0x1b0] sm:$0xff]   ;;  %v1223_v60 = vld [vmem:[%s1569_s1 + $0x138] sm:$0xff]   ;;  %v1229_v0 = vld [vmem:[%s1571_s3] sm:$0xff]  }
  0x15   :  { %1039 = vmatpush3.bf16.msra.mxu1 %v1182_v19  ;;  %v1226_v58 = vld [vmem:[%s1570_s0 + $0x14] ss:$28 sps:$4 sm:$0xff]   ;;  %v1227_v61 = vld [vmem:[%s1569_s1 + $0x1b8] sm:$0xff]   ;;  %v1230_v1 = vld [vmem:[%s1571_s3 + $0x8] sm:$0xff]  }
  0x16   :  { %1040 = vmatprep.subr.bf16.mxu1 %v1185_v22  ;;  %v1224_v62 = vld [vmem:[%s1570_s0 + $0x10] ss:$28 sps:$4 sm:$0xff]   ;;  %v1228_v63 = vld [vmem:[%s1570_s0 + $0x18] ss:$28 sps:$4 sm:$0xff]   ;;  %v1233_v4 = vld [vmem:[%s1571_s3 + $0x20] sm:$0xff]  }
  0x17   :  { %1019 = vmatpush3.bf16.msra.mxu0 %v1184_v21  ;;  %v1231_v2 = vld [vmem:[%s1571_s3 + $0x10] sm:$0xff]   ;;  %v1232_v3 = vld [vmem:[%s1571_s3 + $0x18] sm:$0xff]   ;;  %v1234_v5 = vld [vmem:[%s1571_s3 + $0x28] sm:$0xff]  }
  0x18   :  { %1020 = vmatprep.subr.bf16.mxu0 %v1187_v24  ;;  %v1235_v6 = vld [vmem:[%s1571_s3 + $0x30] sm:$0xff]   ;;  %v1236_v7 = vld [vmem:[%s1571_s3 + $0x38] sm:$0xff]   ;;  %v1237_v8 = vld [vmem:[%s1572_s5] sm:$0xff]  }
  0x19   :  { %1041 = vmatpush3.bf16.msra.mxu1 %v1186_v23  ;;  %v1238_v9 = vld [vmem:[%s1572_s5 + $0x8] sm:$0xff]   ;;  %v1239_v10 = vld [vmem:[%s1572_s5 + $0x10] sm:$0xff]   ;;  %v1240_v11 = vld [vmem:[%s1572_s5 + $0x18] sm:$0xff]  }
  0x1a   :  { %1042 = vmatprep.subr.bf16.mxu1 %v1189_v26  ;;  %v1241_v12 = vld [vmem:[%s1572_s5 + $0x20] sm:$0xff]   ;;  %v1242_v13 = vld [vmem:[%s1572_s5 + $0x28] sm:$0xff]  }
  0x1b   :  { %1021 = vmatpush3.bf16.msra.mxu0 %v1188_v25  ;;  %v926_v15 = vld [vmem:[%s1573_s2] ss:$0 sm:$0xff] }
  0x1c   :  { %1022 = vmatprep.subr.bf16.mxu0 %v1191_v28 }
  0x1d   :  { %1043 = vmatpush3.bf16.msra.mxu1 %v1190_v27 }
  0x1e   :  { %1044 = vmatprep.subr.bf16.mxu1 %v1193_v30 }
  0x1f   :  { %1023 = vmatpush3.bf16.msra.mxu0 %v1192_v29 }
  0x20   :  { %1052 = vmatprep.subr.bf16.mxu0 %v1198_v34 }
  0x21   :  { %1045 = vmatpush3.bf16.msra.mxu1 %v1197_v33 }
  0x22   :  { %559 = vmatmul.mubr.bf16.vlgmr.msra.gmra.mrb[0].mxu0 %v1194_v31  ;;  %1101 = vmatprep.subr.bf16.mxu1 %v1245_v38 }
  0x23   :  { %1053 = vmatpush3.bf16.msra.mxu0 %v1202_v37  ;;  %640 = vmatprep.mubr.bf16.mxu0 %v1226_v58 }
  0x24   :  { %600 = vmatmul.mubr.bf16.vlgmr.msra.gmra.mrb[0].mxu1 %v1199_v35  ;;  %1054 = vmatprep.subr.bf16.mxu0 %v1204_v40 }
  0x25   :  { %1102 = vmatpush3.bf16.msra.mxu1 %v1203_v39  ;;  %1117 = vmatprep.mubr.msk.bf16.mxu1 %vm1246_vm0, %v1245_v38 }
  0x26   :  { %1103 = vmatprep.subr.bf16.mxu1 %v1245_v38 }
  0x27   :  { %1055 = vmatpush3.bf16.msra.mxu0 %v1205_v41 }
  0x28   :  { %1056 = vmatprep.subr.bf16.mxu0 %v1207_v43 }
  0x29   :  { %1104 = vmatpush3.bf16.msra.mxu1 %v1206_v42 }
  0x2a   :  { %1105 = vmatprep.subr.bf16.mxu1 %v1245_v38 }
  0x2b   :  { %1057 = vmatpush3.bf16.msra.mxu0 %v1208_v44 }
  0x2c   :  { %1058 = vmatprep.subr.bf16.mxu0 %v1210_v46 }
  0x2d   :  { %1106 = vmatpush3.bf16.msra.mxu1 %v1209_v45 }
  0x2e   :  { %1107 = vmatprep.subr.bf16.mxu1 %v1245_v38 }
  0x2f   :  { %1059 = vmatpush3.bf16.msra.mxu0 %v1211_v47 }
  0x30   :  { %1060 = vmatprep.subr.bf16.mxu0 %v1213_v49  ;;  %v1243_v49 = vld [vmem:[%s1572_s5 + $0x30] sm:$0xff]  }
  0x31   :  { %1108 = vmatpush3.bf16.msra.mxu1 %v1212_v48 }
  0x32   :  { %1109 = vmatprep.subr.bf16.mxu1 %v1245_v38 }
  0x33   :  { %1061 = vmatpush3.bf16.msra.mxu0 %v1214_v50  ;;  %v1244_v50 = vld [vmem:[%s1572_s5 + $0x38] sm:$0xff]  }
  0x34   :  { %1062 = vmatprep.subr.bf16.mxu0 %v1216_v52 }
  0x35   :  { %1110 = vmatpush3.bf16.msra.mxu1 %v1215_v51  ;;  %v990_v51 = vld [vmem:[%s1574_s4] ss:$0 sm:$0xff] }
  0x36   :  { %1111 = vmatprep.subr.bf16.mxu1 %v1245_v38 }
  0x37   :  { %1063 = vmatpush3.bf16.msra.mxu0 %v1217_v53 }
  0x38   :  { %1064 = vmatprep.subr.bf16.mxu0 %v1219_v55 }
  0x39   :  { %1112 = vmatpush3.bf16.msra.mxu1 %v1218_v54 }
  0x3a   :  { %1113 = vmatprep.subr.bf16.mxu1 %v1245_v38 }
  0x3b   :  { %1065 = vmatpush3.bf16.msra.mxu0 %v1220_v56 }
  0x3c   :  { %1066 = vmatprep.subr.bf16.mxu0 %v1222_v59 }
  0x3d   :  { %1114 = vmatpush3.bf16.msra.mxu1 %v1221_v57 }
  0x3e   :  { %1115 = vmatprep.subr.bf16.mxu1 %v1245_v38 }
  0x3f   :  { %1067 = vmatpush3.bf16.msra.mxu0 %v1223_v60 }
  0x40   :  { %1121 = vmatprep.subr.bf16.mxu0 %v1245_v38 }
  0x41   :  { %1116 = vmatpush3.bf16.msra.mxu1 %v1227_v61 }
  0x42   :  { %1141 = vmatprep.subr.bf16.mxu1 %v1245_v38  ;;  %641 = vmatmul.mubr.bf16.vlgmr.msra.gmra.mrb[4].mxu0 %v1224_v62 }
  0x43   :  { %1137 = vmatprep.mubr.msk.bf16.mxu0 %vm1246_vm0, %v1245_v38  ;;  %1122 = vmatpush3.bf16.msra.mxu0 %v1229_v0 }
  0x44   :  { %1118 = vmatmul.mubr.bf16.vlgmr.msra.gmra.mrb[4].mxu1 %v1228_v63  ;;  %1123 = vmatprep.subr.bf16.mxu0 %v1245_v38 }
  0x45   :  { %1157 = vmatprep.mubr.msk.bf16.mxu1 %vm1246_vm0, %v1245_v38  ;;  %1142 = vmatpush3.bf16.msra.mxu1 %v1237_v8 }
  0x46   :  { %1143 = vmatprep.subr.bf16.mxu1 %v1245_v38 }
  0x47   :  { %1124 = vmatpush3.bf16.msra.mxu0 %v1230_v1 }
  0x48   :  { %1125 = vmatprep.subr.bf16.mxu0 %v1245_v38 }
  0x49   :  { %1144 = vmatpush3.bf16.msra.mxu1 %v1238_v9 }
  0x4a   :  { %1145 = vmatprep.subr.bf16.mxu1 %v1245_v38 }
  0x4b   :  { %1126 = vmatpush3.bf16.msra.mxu0 %v1231_v2 }
  0x4c   :  { %1127 = vmatprep.subr.bf16.mxu0 %v1245_v38 }
  0x4d   :  { %1146 = vmatpush3.bf16.msra.mxu1 %v1239_v10 }
  0x4e   :  { %1147 = vmatprep.subr.bf16.mxu1 %v1245_v38 }
  0x4f   :  { %1128 = vmatpush3.bf16.msra.mxu0 %v1232_v3 }
  0x50   :  { %1129 = vmatprep.subr.bf16.mxu0 %v1245_v38 }
  0x51   :  { %1148 = vmatpush3.bf16.msra.mxu1 %v1240_v11 }
  0x52   :  { %1149 = vmatprep.subr.bf16.mxu1 %v1245_v38 }
  0x53   :  { %1130 = vmatpush3.bf16.msra.mxu0 %v1233_v4 }
  0x54   :  { %1131 = vmatprep.subr.bf16.mxu0 %v1245_v38 }
  0x55   :  { %1150 = vmatpush3.bf16.msra.mxu1 %v1241_v12 }
  0x56   :  { %1151 = vmatprep.subr.bf16.mxu1 %v1245_v38 }
  0x57   :  { %1132 = vmatpush3.bf16.msra.mxu0 %v1234_v5 }
  0x58   :  { %1133 = vmatprep.subr.bf16.mxu0 %v1245_v38 }
  0x59   :  { %1152 = vmatpush3.bf16.msra.mxu1 %v1242_v13 }
  0x5a   :  { %1153 = vmatprep.subr.bf16.mxu1 %v1245_v38 }
  0x5b   :  { %1134 = vmatpush3.bf16.msra.mxu0 %v1235_v6 }
  0x5c   :  { %1135 = vmatprep.subr.bf16.mxu0 %v1245_v38 }
  0x5d   :  { %1154 = vmatpush3.bf16.msra.mxu1 %v1243_v49 }
  0x5e   :  { %1155 = vmatprep.subr.bf16.mxu1 %v1245_v38  ;;  %v999_v38 = vld [vmem:[%s1575_s6] ss:$0 sm:$0xff] }
  0x5f   :  { %1136 = vmatpush3.bf16.msra.mxu0 %v1236_v7 }
  0x61   :  { %1156 = vmatpush3.bf16.msra.mxu1 %v1244_v50 }
  0xf5   :  { %v1024_v14 = vpop.f32.mrb[0].mxu0 }
  0xf6   :  { %v1025_v16 = vpop.f32.mrb[1].mxu0 }
  0xf7   :  { %v1026_v17 = vadd.f32 %v1025_v16, %v1024_v14  ;;  %v1027_v18 = vpop.f32.mrb[2].mxu0  ;;  %v1046_v19 = vpop.f32.mrb[0].mxu1 }
  0xf8   :  { %v1028_v20 = vpop.f32.mrb[3].mxu0  ;;  %v1047_v23 = vpop.f32.mrb[1].mxu1 }
  0xf9   :  { %v561_v21 = vadd.f32 %v1026_v17, %v926_v15  ;;  %v1029_v22 = vadd.f32 %v1028_v20, %v1027_v18  ;;  %v1048_v24 = vadd.f32 %v1047_v23, %v1046_v19  ;;  %v1049_v25 = vpop.f32.mrb[2].mxu1 }
  0xfa   :  { %v1050_v27 = vpop.f32.mrb[3].mxu1 }
  0xfb   :  { %v564_v26 = vadd.f32 %v1029_v22, %v926_v15  ;;  %v602_v28 = vadd.f32 %v1048_v24, %v561_v21  ;;  %v1051_v29 = vadd.f32 %v1050_v27, %v1049_v25 }
  0xfd   :  { %v605_v30 = vadd.f32 %v1051_v29, %v564_v26 }
 0x115   :  { %v1068_v31 = vpop.f32.mrb[4].mxu0 }
 0x116   :  { %v1069_v32 = vpop.f32.mrb[5].mxu0 }
 0x117   :  { %v683_v33 = vpop.f32.mrb[4].mxu1  ;;  %v1070_v34 = vadd.f32 %v1069_v32, %v1068_v31  ;;  %v1071_v35 = vpop.f32.mrb[6].mxu0 }
 0x118   :  { %v1119_v36 = vpop.f32.mrb[5].mxu1  ;;  %v1072_v37 = vpop.f32.mrb[7].mxu0 }
 0x119   :  { %v686_v39 = vpop.f32.mrb[6].mxu1  ;;  %v643_v40 = vadd.f32 %v1070_v34, %v602_v28  ;;  %v1073_v41 = vadd.f32 %v1072_v37, %v1071_v35 }
 0x11a   :  { %v1120_v42 = vpop.f32.mrb[7].mxu1 }
 0x11b   :  { %v684_v43 = vadd.f32 %v683_v33, %v643_v40  ;;  %v646_v44 = vadd.f32 %v1073_v41, %v605_v30 }
 0x11d   :  { %v687_v45 = vadd.f32 %v686_v39, %v646_v44  ;;  %v690_v46 = vmax.f32 %v684_v43, 0.0 }
 0x11f   :  { %v691_v47 = vmax.f32 %v687_v45, 0.0 }
 0x121   :  { %v692_v48 = vpack.c.bf16 %v691_v47, %v690_v46 }
 0x123   :  { %1138 = vmatmul.mubr.bf16.vlgmr.msra.gmra.mrb[8].mxu0 %v692_v48 }
 0x1f6   :  { %v798_v52 = vpop.f32.mrb[8].mxu0 }
 0x1f7   :  { %v799_v53 = vadd.f32 %v990_v51, %v798_v52  ;;  %v1139_v54 = vpop.f32.mrb[9].mxu0 }
 0x1f8   :  { %v801_v55 = vpop.f32.mrb[10].mxu0 }
 0x1f9   :  { %v802_v56 = vadd.f32 %v990_v51, %v801_v55  ;;  %v1140_v57 = vpop.f32.mrb[11].mxu0  ;;  %v805_v58 = vmax.f32 %v799_v53, 0.0 }
 0x1fb   :  { %v806_v59 = vmax.f32 %v802_v56, 0.0 }
 0x1fd   :  { %v807_v60 = vpack.c.bf16 %v806_v59, %v805_v58 }
 0x1ff   :  { %1158 = vmatmul.mubr.bf16.vlgmr.msra.gmra.mrb[8].mxu1 %v807_v60 }
 0x2d2   :  { %v913_v61 = vpop.f32.mrb[8].mxu1 }
 0x2d3   :  { %v914_v62 = vadd.f32 %v999_v38, %v913_v61  ;;  %v1159_v63 = vpop.f32.mrb[9].mxu1 }
 0x2d4   :  { %v916_v0 = vpop.f32.mrb[10].mxu1 }
 0x2d5   :  { %920 = vst [vmem:[%s1576_s7] sm:$0xff] %v914_v62  ;;  %v917_v1 = vadd.f32 %v999_v38, %v916_v0  ;;  %v1160_v2 = vpop.f32.mrb[11].mxu1 }
 0x2d7   :  { %921 = vst [vmem:[%s1576_s7 + $0x8] sm:$0xff] %v917_v1 }

</bundles_post_ra>
